<compile_context>
chip_gen: v5e
topology: v5e:2x2
jax: 0.10.0
libtpu: 0.0.40
codegen_flags: <defaults>
</compile_context>

<pallas_src>
import math

import jax
import jax.numpy as jnp
from jax.experimental import pallas as pl
from jax.experimental.pallas import tpu as pltpu


_GELU_C = math.sqrt(2.0 / math.pi)


def _gelu_tanh_f32(x):
    # PyTorch nn.GELU(approximate='tanh'), evaluated in f32:
    # 0.5 * x * (1 + tanh(sqrt(2/pi) * (x + 0.044715 * x^3)))
    return 0.5 * x * (1.0 + jnp.tanh(_GELU_C * (x + 0.044715 * x * x * x)))


def mlp_kernel(x_ref, wfc_ref, bfc_ref, wproj_ref, bproj_ref, o_ref, acc_ref):
    # x_ref:     (tm, C)  compute dtype (bf16)
    # wfc_ref:   (C, th)  compute dtype      bfc_ref:   (1, th) f32
    # wproj_ref: (th, C)  compute dtype      bproj_ref: (1, C)  f32
    # o_ref:     (tm, C)  output dtype
    # acc_ref:   (tm, C)  f32 scratch accumulator (persists across k)
    k = pl.program_id(1)

    @pl.when(k == 0)
    def _init():
        # Fold the projection bias into the accumulator once.
        acc_ref[...] = jnp.broadcast_to(
            bproj_ref[...].astype(jnp.float32), acc_ref.shape)

    # First matmul: bf16 x bf16 -> f32 accumulate on the MXU.
    h = jnp.dot(x_ref[...], wfc_ref[...], preferred_element_type=jnp.float32)
    # Bias + GELU in f32 (EUP tanh), then back to bf16 for the second matmul.
    h = _gelu_tanh_f32(h + bfc_ref[...])
    h = h.astype(wproj_ref.dtype)

    acc_ref[...] += jnp.dot(h, wproj_ref[...],
                            preferred_element_type=jnp.float32)

    @pl.when(k == pl.num_programs(1) - 1)
    def _finalize():
        o_ref[...] = acc_ref[...].astype(o_ref.dtype)


def mlp_forward(x, w_fc, b_fc, w_proj, b_proj, *, tm=256, th=512,
                compute_dtype=jnp.bfloat16):
    """x: (B, T, C). w_fc: (C, 4C), b_fc: (4C,), w_proj: (4C, C), b_proj: (C,)."""
    B, T, C = x.shape
    H = w_fc.shape[1]
    M = B * T

    tm = min(tm, M)
    th = min(th, H)
    assert M % tm == 0, "row count M=B*T must be divisible by tm"
    assert H % th == 0, "hidden dim 4*C must be divisible by th"
    assert tm == M or tm % 8 == 0, "tm must be a multiple of 8 (or == M)"
    assert th == H or th % 128 == 0, "th must be a multiple of 128 (or == H)"
    # Note: for best store throughput keep C a multiple of 128 (GPT-2 C=768 ok);
    # C < 128 still works but lowers to masked partial stores.

    out_dtype = x.dtype
    x2d = x.reshape(M, C).astype(compute_dtype)
    w_fc_c = w_fc.astype(compute_dtype)
    w_proj_c = w_proj.astype(compute_dtype)
    b_fc2 = b_fc.reshape(1, H).astype(jnp.float32)
    b_proj2 = b_proj.reshape(1, C).astype(jnp.float32)

    # VMEM budget estimate (double-buffered operands + f32 accumulator +
    # h intermediate), with headroom; capped at 64 MiB so it is valid on v7x.
    in_b = jnp.dtype(compute_dtype).itemsize
    out_b = jnp.dtype(out_dtype).itemsize
    est = (2 * (tm * C * in_b + C * th * in_b + th * 4
                + th * C * in_b + C * 4 + tm * C * out_b)
           + tm * C * 4 + 2 * tm * th * 4)
    vmem_limit = min(2 * est + (8 << 20), 64 << 20)

    out2d = pl.pallas_call(
        mlp_kernel,
        out_shape=jax.ShapeDtypeStruct((M, C), out_dtype),
        grid_spec=pltpu.PrefetchScalarGridSpec(
            num_scalar_prefetch=0,
            grid=(M // tm, H // th),          # reduction axis (H) last
            in_specs=[
                pl.BlockSpec((tm, C), lambda i, k: (i, 0)),   # x row tile
                pl.BlockSpec((C, th), lambda i, k: (0, k)),   # W_fc slab
                pl.BlockSpec((1, th), lambda i, k: (0, k)),   # b_fc slab
                pl.BlockSpec((th, C), lambda i, k: (k, 0)),   # W_proj slab
                pl.BlockSpec((1, C), lambda i, k: (0, 0)),    # b_proj
            ],
            out_specs=pl.BlockSpec((tm, C), lambda i, k: (i, 0)),
            scratch_shapes=[pltpu.VMEM((tm, C), jnp.float32)],
        ),
        compiler_params=pltpu.CompilerParams(
            dimension_semantics=("parallel", "arbitrary"),
            vmem_limit_bytes=vmem_limit),
    )(x2d, w_fc_c, b_fc2, w_proj_c, b_proj2)

    return out2d.reshape(B, T, C)


def mlp_reference(x, w_fc, b_fc, w_proj, b_proj):
    # Pure-JAX f32 reference.
    h = jnp.einsum("btc,ch->bth", x.astype(jnp.float32),
                   w_fc.astype(jnp.float32)) + b_fc.astype(jnp.float32)
    h = _gelu_tanh_f32(h)
    y = jnp.einsum("bth,hc->btc", h, w_proj.astype(jnp.float32)) \
        + b_proj.astype(jnp.float32)
    return y.astype(x.dtype)


if __name__ == "__main__":
    # Small GPT-2-style config: n_embd = 128, hidden = 4 * n_embd = 512.
    # Small enough to run instantly, big enough to be lane-dense (C % 128 == 0)
    # and to exercise both grid axes (2 row tiles x 2 hidden slabs).
    B, T, C = 2, 128, 128
    H = 4 * C

    key = jax.random.PRNGKey(0)
    kx, kw1, kb1, kw2, kb2 = jax.random.split(key, 5)

    x = jax.random.normal(kx, (B, T, C), dtype=jnp.float32)
    # nn.Linear(n_embd, 4*n_embd): weight (4C, C) -> stored transposed as (C, 4C)
    w_fc = (0.02 * jax.random.normal(kw1, (C, H))).astype(jnp.float32)
    b_fc = (0.02 * jax.random.normal(kb1, (H,))).astype(jnp.float32)
    # nn.Linear(4*n_embd, n_embd): weight (C, 4C) -> stored transposed as (4C, C)
    w_proj = (0.02 * jax.random.normal(kw2, (H, C))).astype(jnp.float32)
    b_proj = (0.02 * jax.random.normal(kb2, (C,))).astype(jnp.float32)

    out = mlp_forward(x, w_fc, b_fc, w_proj, b_proj, tm=128, th=256)
    out = jax.block_until_ready(out)

    ref = mlp_reference(x, w_fc, b_fc, w_proj, b_proj)
    assert out.shape == (B, T, C)
    # bf16 MXU operands (f32 accumulation) -> tolerances relaxed vs pure f32.
    assert jnp.allclose(out, ref, atol=1e-2, rtol=5e-2), "mismatch vs reference"

    print("KERNEL_OK")
</pallas_src>

<mosaic_0001>
module attributes {stable_mosaic.version = 11 : i64} {
  func.func @mlp_kernel(%arg0: i32, %arg1: i32, %arg2: memref<128x128xbf16, #tpu.memory_space<vmem>>, %arg3: memref<128x256xbf16, #tpu.memory_space<vmem>>, %arg4: memref<1x256xf32, #tpu.memory_space<vmem>>, %arg5: memref<256x128xbf16, #tpu.memory_space<vmem>>, %arg6: memref<1x128xf32, #tpu.memory_space<vmem>>, %arg7: memref<128x128xf32, #tpu.memory_space<vmem>>, %arg8: memref<128x128xf32, #tpu.memory_space<vmem>>) attributes {dimension_semantics = [#tpu.dimension_semantics<parallel>, #tpu.dimension_semantics<arbitrary>], iteration_bounds = array<i64: 2, 2>, scalar_prefetch = 0 : i64, scratch_operands = 1 : i64, tpu.core_type = #tpu.core_type<tc>, window_params = [{transform_indices = @transform_0, window_bounds = array<i64: 128, 128>}, {transform_indices = @transform_1, window_bounds = array<i64: 128, 256>}, {transform_indices = @transform_2, window_bounds = array<i64: 1, 256>}, {transform_indices = @transform_3, window_bounds = array<i64: 256, 128>}, {pipeline_mode = #tpu.pipeline_mode<synchronous>, transform_indices = @transform_4, window_bounds = array<i64: 1, 128>}, {transform_indices = @transform_5, window_bounds = array<i64: 128, 128>}]} {
    %c0_i32 = arith.constant 0 : i32
    %0 = arith.cmpi eq, %arg1, %c0_i32 : i32
    %1 = arith.extui %0 : i1 to i32
    %c0_i32_0 = arith.constant 0 : i32
    %2 = arith.cmpi ne, %1, %c0_i32_0 : i32
    scf.if %2 {
      %c0_18 = arith.constant 0 : index
      %c0_19 = arith.constant 0 : index
      %31 = vector.load %arg6[%c0_18, %c0_19] : memref<1x128xf32, #tpu.memory_space<vmem>>, vector<1x128xf32>
      %32 = vector.shape_cast %31 : vector<1x128xf32> to vector<1x128xf32>
      %33 = vector.broadcast %32 : vector<1x128xf32> to vector<128x128xf32>
      %c0_20 = arith.constant 0 : index
      %c0_21 = arith.constant 0 : index
      %34 = vector.load %arg8[%c0_20, %c0_21] : memref<128x128xf32, #tpu.memory_space<vmem>>, vector<128x128xf32>
      tpu.vector_store %arg8[%c0_20, %c0_21], %33 {strides = array<i32>} : memref<128x128xf32, #tpu.memory_space<vmem>>, vector<128x128xf32>,
    } else {
    }
    %c0 = arith.constant 0 : index
    %c0_1 = arith.constant 0 : index
    %3 = vector.load %arg2[%c0, %c0_1] : memref<128x128xbf16, #tpu.memory_space<vmem>>, vector<128x128xbf16>
    %c0_2 = arith.constant 0 : index
    %c0_3 = arith.constant 0 : index
    %4 = vector.load %arg3[%c0_2, %c0_3] : memref<128x256xbf16, #tpu.memory_space<vmem>>, vector<128x256xbf16>
    %cst = arith.constant dense<0.000000e+00> : vector<128x256xf32>
    %5 = tpu.matmul %3, %4, %cst {dimension_numbers = #tpu.dot_dimension_numbers<[1], [0], [0], [1], [0, 0, 1, 1], [], []>} : vector<128x128xbf16>, vector<128x256xbf16>, vector<128x256xf32> -> vector<128x256xf32>
    %c0_4 = arith.constant 0 : index
    %c0_5 = arith.constant 0 : index
    %6 = vector.load %arg4[%c0_4, %c0_5] : memref<1x256xf32, #tpu.memory_space<vmem>>, vector<1x256xf32>
    %7 = vector.broadcast %6 : vector<1x256xf32> to vector<128x256xf32>
    %8 = arith.addf %5, %7 : vector<128x256xf32>
    %cst_6 = arith.constant 5.000000e-01 : f32
    %9 = vector.broadcast %cst_6 : f32 to vector<128x256xf32>
    %10 = arith.mulf %9, %8 : vector<128x256xf32>
    %cst_7 = arith.constant 4.471500e-02 : f32
    %11 = vector.broadcast %cst_7 : f32 to vector<128x256xf32>
    %12 = arith.mulf %11, %8 : vector<128x256xf32>
    %13 = arith.mulf %12, %8 : vector<128x256xf32>
    %14 = arith.mulf %13, %8 : vector<128x256xf32>
    %15 = arith.addf %8, %14 : vector<128x256xf32>
    %cst_8 = arith.constant 0.797884583 : f32
    %16 = vector.broadcast %cst_8 : f32 to vector<128x256xf32>
    %17 = arith.mulf %16, %15 : vector<128x256xf32>
    %18 = math.tanh %17 : vector<128x256xf32>
    %cst_9 = arith.constant 1.000000e+00 : f32
    %19 = vector.broadcast %cst_9 : f32 to vector<128x256xf32>
    %20 = arith.addf %19, %18 : vector<128x256xf32>
    %21 = arith.mulf %10, %20 : vector<128x256xf32>
    %22 = arith.truncf %21 : vector<128x256xf32> to vector<128x256xbf16>
    %c0_10 = arith.constant 0 : index
    %c0_11 = arith.constant 0 : index
    %23 = vector.load %arg8[%c0_10, %c0_11] : memref<128x128xf32, #tpu.memory_space<vmem>>, vector<128x128xf32>
    %c0_12 = arith.constant 0 : index
    %c0_13 = arith.constant 0 : index
    %24 = vector.load %arg5[%c0_12, %c0_13] : memref<256x128xbf16, #tpu.memory_space<vmem>>, vector<256x128xbf16>
    %cst_14 = arith.constant dense<0.000000e+00> : vector<128x128xf32>
    %25 = tpu.matmul %22, %24, %cst_14 {dimension_numbers = #tpu.dot_dimension_numbers<[1], [0], [0], [1], [0, 0, 1, 1], [], []>} : vector<128x256xbf16>, vector<256x128xbf16>, vector<128x128xf32> -> vector<128x128xf32>
    %26 = arith.addf %23, %25 : vector<128x128xf32>
    %c0_15 = arith.constant 0 : index
    %c0_16 = arith.constant 0 : index
    %27 = vector.load %arg8[%c0_15, %c0_16] : memref<128x128xf32, #tpu.memory_space<vmem>>, vector<128x128xf32>
    tpu.vector_store %arg8[%c0_15, %c0_16], %26 {strides = array<i32>} : memref<128x128xf32, #tpu.memory_space<vmem>>, vector<128x128xf32>,
    %c1_i32 = arith.constant 1 : i32
    %28 = arith.cmpi eq, %arg1, %c1_i32 : i32
    %29 = arith.extui %28 : i1 to i32
    %c0_i32_17 = arith.constant 0 : i32
    %30 = arith.cmpi ne, %29, %c0_i32_17 : i32
    scf.if %30 {
      %c0_18 = arith.constant 0 : index
      %c0_19 = arith.constant 0 : index
      %31 = vector.load %arg8[%c0_18, %c0_19] : memref<128x128xf32, #tpu.memory_space<vmem>>, vector<128x128xf32>
      %c0_20 = arith.constant 0 : index
      %c0_21 = arith.constant 0 : index
      %32 = vector.load %arg7[%c0_20, %c0_21] : memref<128x128xf32, #tpu.memory_space<vmem>>, vector<128x128xf32>
      tpu.vector_store %arg7[%c0_20, %c0_21], %31 {strides = array<i32>} : memref<128x128xf32, #tpu.memory_space<vmem>>, vector<128x128xf32>,
    } else {
    }
    return
  }
  func.func @transform_0(%arg0: i32, %arg1: i32) -> (i32, i32) {
    %c0_i32 = arith.constant 0 : i32
    %c0_i32_0 = arith.constant 0 : i32
    return %arg0, %c0_i32 : i32, i32
  }
  func.func @transform_1(%arg0: i32, %arg1: i32) -> (i32, i32) {
    %c0_i32 = arith.constant 0 : i32
    %c0_i32_0 = arith.constant 0 : i32
    return %c0_i32, %arg1 : i32, i32
  }
  func.func @transform_2(%arg0: i32, %arg1: i32) -> (i32, i32) {
    %c0_i32 = arith.constant 0 : i32
    %c0_i32_0 = arith.constant 0 : i32
    return %c0_i32, %arg1 : i32, i32
  }
  func.func @transform_3(%arg0: i32, %arg1: i32) -> (i32, i32) {
    %c0_i32 = arith.constant 0 : i32
    %c0_i32_0 = arith.constant 0 : i32
    return %arg1, %c0_i32 : i32, i32
  }
  func.func @transform_4(%arg0: i32, %arg1: i32) -> (i32, i32) {
    %c0_i32 = arith.constant 0 : i32
    %c0_i32_0 = arith.constant 0 : i32
    %c0_i32_1 = arith.constant 0 : i32
    return %c0_i32, %c0_i32_0 : i32, i32
  }
  func.func @transform_5(%arg0: i32, %arg1: i32) -> (i32, i32) {
    %c0_i32 = arith.constant 0 : i32
    %c0_i32_0 = arith.constant 0 : i32
    return %arg0, %c0_i32 : i32, i32
  }
}

</mosaic_0001>

<bundles_post_ra>
// kernel: tpu_custom_call.1
= control target key start
LH: loop header
LB: loop body
LE: loop exit
PB: predicated region body
PF: predicated region fallthrough
CT: control target
= control target key end

     0   :  { %s2726_s0 = inlined_call_operand.hbm [shape: bf16[256,128], index: 0, kind: input, shape index: {}]   ;;  %s2727_s1 = inlined_call_operand.hbm [shape: bf16[128,512], index: 1, kind: input, shape index: {}]   ;;  %s2728_s2 = inlined_call_operand.hbm [shape: f32[1,512], index: 2, kind: input, shape index: {}]   ;;  %s2729_s3 = inlined_call_operand.hbm [shape: bf16[512,128], index: 3, kind: input, shape index: {}]   ;;  %s2730_s4 = inlined_call_operand.vmem [shape: f32[1,128], index: 4, kind: input, shape index: {}]   ;;  %s2731_s5 = inlined_call_operand.hbm [shape: f32[256,128], index: 5, kind: output, shape index: {}]  }
   0x1   :  { %2746 = sst [smem:[#allocation28_spill]] %s2726_s0 }
   0x2   :  { %2747 = sst [smem:[#allocation29_spill]] %s2727_s1 }
   0x3   :  { %2748 = sst [smem:[#allocation30_spill]] %s2730_s4 }
   0x4   :  { %2749 = sst [smem:[#allocation31_spill]] %s2731_s5 }
   0x5   :  { %10 = vsyncpa [#allocation4], 0 }
   0x6   :  { %12 = vsyncpa [#allocation4 + $0x1], 0 }
   0x7   :  { %13 = vsyncpa [#allocation7], 0 }
   0x8   :  { %15 = vsyncpa [#allocation7 + $0x1], 0 }
   0x9   :  { %16 = vsyncpa [#allocation10], 0 }
   0xa   :  { %18 = vsyncpa [#allocation10 + $0x1], 0 }
   0xb   :  { %19 = vsyncpa [#allocation5], 0 }
   0xc   :  { %21 = vsyncpa [#allocation5 + $0x1], 0  ;;  %s2160_s18 = smov 0   ;;  %s2162_s19 = smov 0  }
   0xd   :  { %s2164_s20 = smov 0   ;;  %s2166_s21 = smov 0  }
   0xe   :  { %s2168_s22 = smov 0   ;;  %s2170_s23 = smov 0  }
   0xf   :  { %s2172_s24 = smov 0   ;;  %s2174_s25 = smov 0  }
  0x10   :  { %s2176_s26 = smov 0   ;;  %s2178_s27 = smov 0  }
  0x11   :  { %s2180_s28 = smov 0  }
  0x12 LB: > { %2750 = sst [smem:[#allocation16_spill]] %s2089_s20  ;;  %p54_p0 = scmp.eq.s32.totalorder %s2121_s28, 0  ;;  %s2121_s28 = sphi %s2180_s28, %s27_s28   ;;  %s2117_s27 = sphi %s2178_s27, %s2787_s27   ;;  %s2113_s26 = sphi %s2176_s26, %s2793_s26   ;;  %s2109_s25 = sphi %s2174_s25, %s2785_s25   ;;  %s2105_s24 = sphi %s2172_s24, %s2792_s24   ;;  %s2101_s23 = sphi %s2170_s23, %s2784_s23   ;;  %s2097_s22 = sphi %s2168_s22, %s2791_s22   ;;  %s2093_s21 = sphi %s2166_s21, %s2790_s21   ;;  %s2089_s20 = sphi %s2164_s20, %s2782_s20   ;;  %s2085_s19 = sphi %s2162_s19, %s2789_s19   ;;  %s2081_s18 = sphi %s2160_s18, %s2788_s18  }
  0x13   : > { %2751 = sst [smem:[#allocation17_spill]] %s2093_s21  ;;  %s72_s29 = sadd.s32 1, %s2089_s20 }
  0x14   : > { %2752 = sst [smem:[#allocation18_spill]] %s2101_s23  ;;  %p79_p1 = scmp.ne.s32.totalorder %s2089_s20, %s2085_s19 }
  0x15   : > { %2753 = sst [smem:[#allocation19_spill]] %s2109_s25  ;;  %p85_p2 = scmp.ne.s32.totalorder %s2085_s19, %s2081_s18 }
  0x16   : > { %2754 = sst [smem:[#allocation20_spill]] %s2117_s27  ;;  %p2734_p3 = scmp.lt.s32.totalorder %s2121_s28, 4 }
  0x17   : > { %2755 = sst [smem:[#allocation21_spill]] %s2121_s28  ;;  %p81_p4 = por %p79_p1, %p54_p0 }
  0x18   : > { %s233_s30 = sand.u32 1, %s2121_s28   ;;  %s2226_s6 = sand.u32 1, %s2089_s20  }
  0x19   : > { %s2732_s7 = sshll.u32 %s2226_s6, 7  ;;  %s1639_s8 = sshll.u32 %s2113_s26, 3 }
  0x1a   : > { %s2756_s1 = sld [smem:[#allocation29_spill]]  ;;  %s237_s13 = scalar_lea.vmem [#allocation6], %s2732_s7 }
  0x1b   : > { %s245_s14 = sshll.u32 %s237_s13, 4  ;;  %p2237_p5 = pnand %p2734_p3, %p81_p4  ;;  %s246_s14 = int_to_ptr.vmem [resolvable:$true] %s245_s14 }
  0x1c   : > { %p1465_p6 = scmp.ge.s32.totalorder %s2121_s28, 1  ;;  %s2242_s16 = scalar_lea.sflag [#allocation7], %s233_s30 }
  0x1d   : > { %s2123_s17 = smov 256   ;;  %s2125_s9 = smov 8  }
  0x1e   : > { %p294_p7 = scmp.lt.s32.totalorder %s2121_s28, 5  ;;  %s2253_s30 = sadd.s32 4294967295, %s2121_s28  }
  0x1f   : > { %s36_s13 = sadd.s32 1, %s2113_s26  ;;  %s39_s7 = sadd.s32 1, %s2117_s27 }
  0x20   : > { %s242_s11 = scalar_lea.hbm %s2756_s1, %s1639_s8  ;;  %s2124_s8 = smov 128  }
  0x21   : > { %s243_s12 = sshll.u32 %s242_s11, 4  ;;  %p2248_p8 = pnand %p1465_p6, %p294_p7  ;;  %s244_s12 = int_to_ptr.hbm [resolvable:$true] %s243_s12 }
  0x22   : > { %1698 = dma.hbm_to_vmem [thread:$0]  (!%p2237_p5), %s244_s12, 2048, %s246_s14, %s2242_s16, %s2123_s17, %s2124_s8, %s2125_s9  }
  0x23   : > { %s1451_s11 = sadd.s32 4294967294, %s2121_s28   ;;  %p37_p9 = scmp.ge.s32.totalorder %s36_s13, 2 }
  0x24   : > { %s46_s12 = sadd.s32 1, %s2101_s23  ;;  %p53_p10 = scmp.ne.s32.totalorder %s2101_s23, %s2097_s22 }
  0x25   : > { %p59_p11 = scmp.ne.s32.totalorder %s2097_s22, %s2093_s21  ;;  %s2795_s13 = smov (%p37_p9, %s36_s13), 0 }
  0x26   : > { %2759 = sst [smem:[#allocation22_spill]] %s2795_s13  ;;  %s2797_s7 = smov (!%p37_p9, %s39_s7), %s2117_s27 }
  0x27   : > { %p2271_p12 = por %p54_p0, %p53_p10  ;;  %p60_p13 = scmp.eq.s32.totalorder %s2253_s30, 0 }
  0x28   : > { %p41_p1 = scmp.ge.s32.totalorder %s2797_s7, 2  ;;  %s69_s17 = ssub.s32 %s2113_s26, %s2795_s13 }
  0x29   : > { %p2281_p4 = por %p60_p13, %p59_p11  ;;  %p70_p6 = scmp.eq.s32.totalorder %s69_s17, 0 }
  0x2a   : > { %s2799_s7 = smov (%p41_p1, %s2797_s7), 0  ;;  %p2297_p0 = por %p85_p2, %p60_p13 }
  0x2b   : > { %2762 = sst [smem:[#allocation23_spill]] %s2799_s7  ;;  %s43_s1 = ssub.s32 %s2117_s27, %s2799_s7 }
  0x2c   : > { %s2290_s9 = scalar_select %p70_p6, %s2089_s20, %s72_s29  }
  0x2d   : > { %p44_p7 = scmp.eq.s32.totalorder %s43_s1, 0  ;;  %p182_p9 = scmp.eq.s32.totalorder %s2253_s30, 3 }
  0x2e   : > { %2763 = sst [smem:[#allocation24_spill]] %s2290_s9  ;;  %p188_p3 = scmp.eq.s32.totalorder %s1451_s11, 3 }
  0x2f   : > { %s211_s13 = sand.u32 1, %s2101_s23   ;;  %p2309_p1 = por %p182_p9, %p53_p10 }
  0x30   : > { %s2304_s17 = scalar_select %p44_p7, %s2101_s23, %s46_s12  }
  0x31   : > { %s2766_s25 = scalar_select %p2309_p1, 1, 0 }
  0x32   : > { %2765 = sst [smem:[#allocation25_spill]] %s2304_s17  ;;  %p2316_p2 = por %p188_p3, %p59_p11 }
  0x33   : > { %2767 = sst [smem:[#allocation26_spill]] %s2766_s25  ;;  %s1454_s29 = sshll.u32 %s211_s13, 6 }
  0x34   : > { %s2768_s18 = scalar_select %p2316_p2, 1, 0 }
  0x35   : > { %s1638_s7 = sshll.u32 %s2117_s27, 6  ;;  %s2770_s0 = sld [smem:[#allocation28_spill]] }
  0x36   : > { %2769 = sst [smem:[#allocation27_spill]] %s2768_s18  ;;  %s215_s20 = scalar_lea.vmem [#allocation3], %s1454_s29 }
  0x37   : > { %s223_s12 = sshll.u32 %s215_s20, 4  ;;  %p2771_p10 = scmp.lt.s32.totalorder %s2121_s28, 4  ;;  %s224_s12 = int_to_ptr.vmem [resolvable:$true] %s223_s12 }
  0x38   : > { %s1460_s23 = sshll.u32 %s2226_s6, 1  ;;  %s212_s18 = scalar_lea.sflag [#allocation4], %s211_s13 }
  0x39   : > { %p1693_p3 = pnand %p2771_p10, %p2271_p12  ;;  %s2126_s21 = smov 64  }
  0x3a   : > { %s2127_s27 = smov 4   ;;  %s1461_s9 = sshll.u32 %s2113_s26, 1 }
  0x3b   : > { %s220_s11 = scalar_lea.hbm %s2770_s0, %s1638_s7  ;;  %s263_s20 = scalar_lea.hbm %s2728_s2, %s1461_s9 }
  0x3c   : > { %s221_s17 = sshll.u32 %s220_s11, 4  ;;  %s259_s1 = scalar_lea.vmem [#allocation8], %s1460_s23  ;;  %s222_s17 = int_to_ptr.hbm [resolvable:$true] %s221_s17 }
  0x3d   : > { %1695 = dma.hbm_to_vmem [thread:$0]  (!%p1693_p3), %s222_s17, 1024, %s224_s12, %s212_s18, %s2126_s21, %s2126_s21, %s2127_s27  }
  0x3e   : > { %s267_s11 = sshll.u32 %s259_s1, 4  ;;  %s265_s0 = sshll.u32 %s263_s20, 4  ;;  %s268_s11 = int_to_ptr.vmem [resolvable:$true] %s267_s11  ;;  %s266_s0 = int_to_ptr.hbm [resolvable:$true] %s265_s0 }
  0x3f   : > { %1701 = dma.hbm_to_vmem [thread:$0]  (!%p2237_p5), %s266_s0, 32, %s268_s11, %s2242_s16  }
  0x40   : > { %s1640_s14 = sshll.u32 %s2113_s26, 7  ;;  %s2772_s17 = sshll.u32 %s2226_s6, 7 }
  0x41   : > { %s283_s25 = scalar_lea.hbm %s2729_s3, %s1640_s14  ;;  %s278_s18 = scalar_lea.vmem [#allocation9], %s2772_s17 }
  0x42   : > { %s286_s12 = sshll.u32 %s278_s18, 4  ;;  %s284_s4 = sshll.u32 %s283_s25, 4  ;;  %s287_s12 = int_to_ptr.vmem [resolvable:$true] %s286_s12  ;;  %s285_s4 = int_to_ptr.hbm [resolvable:$true] %s284_s4 }
  0x43   : > { %s275_s7 = scalar_lea.sflag [#allocation10], %s2226_s6  ;;  %298 = sbr.rel (%p2248_p8) target bundleno = 594 (0x252), region = 40 }
  0x44   : > { %1704 = dma.hbm_to_vmem [thread:$0]  (!%p2237_p5), %s285_s4, 2048, %s287_s12, %s275_s7, %s2126_s21, %s2126_s21, %s2127_s27  }
  0x45   : > { %s2348_s0 = sand.u32 (!%p2248_p8), 1, %s2097_s22  }
  0x46   : > { %s1466_s23 = sshll.u32 (!%p2248_p8), %s2348_s0, 6  ;;  %s301_s28 = scalar_lea.sflag (!%p2248_p8), [#allocation4], %s2348_s0 }
  0x47   : > { %s2352_s16 = scalar_lea.vmem (!%p2248_p8), [#allocation3], %s1466_s23 }
  0x48   : > { %2064 = dma.done.wait (%p2281_p4), %s301_s28, 1024  }
  0x49   : > { %2066 = vsyncadd (%p2281_p4), %s301_s28, 4294966272  ;;  %s310_s4 = sand.u32 1, %s2253_s30   ;;  %s312_s21 = sand.u32 1, %s2085_s19  }
  0x4a   : > { %s1467_s25 = sshll.u32 %s312_s21, 7  ;;  %s311_s27 = scalar_lea.sflag [#allocation7], %s310_s4 }
  0x4b   : > { %s2360_s6 = scalar_lea.vmem [#allocation6], %s1467_s25 }
  0x4c   : > { %2068 = dma.done.wait (%p2297_p0), %s311_s27, 2080  }
  0x4d   : > { %2070 = vsyncadd (%p2297_p0), %s311_s27, 4294965216  ;;  %s1468_s15 = sshll.u32 %s312_s21, 1  ;;  %s331_s8 = scalar_lea.sflag [#allocation10], %s312_s21 }
  0x4e   : > { %s2366_s10 = scalar_lea.vmem [#allocation8], %s1468_s15  ;;  %s2368_s9 = scalar_lea.vmem [#allocation9], %s1467_s25 }
  0x4f   : > { %2072 = dma.done.wait (%p2297_p0), %s331_s8, 2048  }
  0x50   : > { %2074 = vsyncadd (%p2297_p0), %s331_s8, 4294965248  ;;  %s1470_s30 = sshll.u32 %s2348_s0, 7  ;;  %p1471_p5 = scmp.ne.s32.totalorder %s2105_s24, 0 }
  0x51   : > { %s2375_s29 = scalar_lea.vmem [#allocation11], %s1470_s30  ;;  %s2773_s11 = sld [smem:[#allocation30_spill]] (!%p1471_p5) }
  0x52   : > { %385 = sbr.rel (%p1471_p5) target bundleno = 104 (0x68), region = 60 }
  0x57   : > { %v1806_v0 = vld [vmem:[%s2773_s11] ss:$0 sm:$0xff] }
  0x58   : > { %390 = vst [vmem:[#allocation2 + $0x30] sm:$0xff] %v1806_v0 }
  0x59   : > { %391 = vst [vmem:[#allocation2] sm:$0xff] %v1806_v0 }
  0x5a   : > { %392 = vst [vmem:[#allocation2 + $0x58] sm:$0xff] %v1806_v0 }
  0x5b   : > { %393 = vst [vmem:[#allocation2 + $0x18] sm:$0xff] %v1806_v0 }
  0x5c   : > { %394 = vst [vmem:[#allocation2 + $0x50] sm:$0xff] %v1806_v0 }
  0x5d   : > { %395 = vst [vmem:[#allocation2 + $0x68] sm:$0xff] %v1806_v0 }
  0x5e   : > { %396 = vst [vmem:[#allocation2 + $0x8] sm:$0xff] %v1806_v0 }
  0x5f   : > { %397 = vst [vmem:[#allocation2 + $0x48] sm:$0xff] %v1806_v0 }
  0x60   : > { %398 = vst [vmem:[#allocation2 + $0x40] sm:$0xff] %v1806_v0 }
  0x61   : > { %399 = vst [vmem:[#allocation2 + $0x20] sm:$0xff] %v1806_v0 }
  0x62   : > { %400 = vst [vmem:[#allocation2 + $0x10] sm:$0xff] %v1806_v0 }
  0x63   : > { %401 = vst [vmem:[#allocation2 + $0x38] sm:$0xff] %v1806_v0 }
  0x64   : > { %402 = vst [vmem:[#allocation2 + $0x60] sm:$0xff] %v1806_v0 }
  0x65   : > { %403 = vst [vmem:[#allocation2 + $0x70] sm:$0xff] %v1806_v0 }
  0x66   : > { %404 = vst [vmem:[#allocation2 + $0x78] sm:$0xff] %v1806_v0 }
  0x67   : > { %405 = vst [vmem:[#allocation2 + $0x28] sm:$0xff] %v1806_v0 }
  0x68 PF: > { %v1562_v1 = vld [vmem:[%s2360_s6 + $0x70] sm:$0xf]  ;;  %v1664_v2 = vld [vmem:[%s2360_s6 + $0x74] sm:$0xf0]  ;;  %v1663_v3 = vld [vmem:[%s2360_s6 + $0x74] sm:$0xf] }
  0x69   : > { %v1563_v4 = vor.u32 %v1664_v2, %v1562_v1  ;;  %v1564_v5 = vld [vmem:[%s2360_s6 + $0x78] sm:$0xf0]  ;;  %v1554_v6 = vld [vmem:[%s2360_s6 + $0x60] sm:$0xf]  ;;  %v1662_v7 = vld [vmem:[%s2360_s6 + $0x64] sm:$0xf0] }
  0x6a   : > { %v1567_v8 = vor.u32 %v1663_v3, %v1564_v5  ;;  %v1661_v9 = vld [vmem:[%s2360_s6 + $0x64] sm:$0xf]  ;;  %v1556_v10 = vld [vmem:[%s2360_s6 + $0x68] sm:$0xf0]  ;;  %v1555_v11 = vor.u32 %v1662_v7, %v1554_v6  ;;  %v1546_v13 = vld [vmem:[%s2360_s6 + $0x50] sm:$0xf] }
  0x6b   : > { %572 = vmatpush.bf16.msra.mxu0 %v1563_v4  ;;  %v1559_v12 = vor.u32 %v1661_v9, %v1556_v10  ;;  %v1660_v14 = vld [vmem:[%s2360_s6 + $0x54] sm:$0xf0]  ;;  %v1659_v15 = vld [vmem:[%s2360_s6 + $0x54] sm:$0xf]  ;;  %v1548_v16 = vld [vmem:[%s2360_s6 + $0x58] sm:$0xf0] }
  0x6c   : > { %621 = vmatpush.bf16.msra.mxu1 %v1567_v8  ;;  %v1547_v17 = vor.u32 %v1660_v14, %v1546_v13  ;;  %v1551_v18 = vor.u32 %v1659_v15, %v1548_v16  ;;  %v1538_v19 = vld [vmem:[%s2360_s6 + $0x40] sm:$0xf]  ;;  %v1658_v20 = vld [vmem:[%s2360_s6 + $0x44] sm:$0xf0]  ;;  %v1657_v21 = vld [vmem:[%s2360_s6 + $0x44] sm:$0xf] }
  0x6d   : > { %v1540_v22 = vld [vmem:[%s2360_s6 + $0x48] sm:$0xf0]  ;;  %v1539_v23 = vor.u32 %v1658_v20, %v1538_v19  ;;  %v1530_v25 = vld [vmem:[%s2360_s6 + $0x30] sm:$0xf]  ;;  %v1656_v26 = vld [vmem:[%s2360_s6 + $0x34] sm:$0xf0] }
  0x6e   : > { %v1543_v24 = vor.u32 %v1657_v21, %v1540_v22  ;;  %v1655_v27 = vld [vmem:[%s2360_s6 + $0x34] sm:$0xf]  ;;  %v1532_v28 = vld [vmem:[%s2360_s6 + $0x38] sm:$0xf0]  ;;  %v1531_v29 = vor.u32 %v1656_v26, %v1530_v25  ;;  %v1522_v31 = vld [vmem:[%s2360_s6 + $0x20] sm:$0xf] }
  0x6f   : > { %573 = vmatpush.bf16.msra.mxu0 %v1555_v11  ;;  %v1535_v30 = vor.u32 %v1655_v27, %v1532_v28  ;;  %v1654_v32 = vld [vmem:[%s2360_s6 + $0x24] sm:$0xf0]  ;;  %v1653_v33 = vld [vmem:[%s2360_s6 + $0x24] sm:$0xf]  ;;  %v1524_v34 = vld [vmem:[%s2360_s6 + $0x28] sm:$0xf0] }
  0x70   : > { %622 = vmatpush.bf16.msra.mxu1 %v1559_v12  ;;  %v1523_v35 = vor.u32 %v1654_v32, %v1522_v31  ;;  %v1527_v36 = vor.u32 %v1653_v33, %v1524_v34  ;;  %v1514_v37 = vld [vmem:[%s2360_s6 + $0x10] sm:$0xf]  ;;  %v1652_v38 = vld [vmem:[%s2360_s6 + $0x14] sm:$0xf0]  ;;  %v1651_v39 = vld [vmem:[%s2360_s6 + $0x14] sm:$0xf] }
  0x71   : > { %v1516_v40 = vld [vmem:[%s2360_s6 + $0x18] sm:$0xf0]  ;;  %v1515_v41 = vor.u32 %v1652_v38, %v1514_v37  ;;  %v1506_v43 = vld [vmem:[%s2360_s6] sm:$0xf]  ;;  %v1650_v44 = vld [vmem:[%s2360_s6 + $0x4] sm:$0xf0] }
  0x72   : > { %v1519_v42 = vor.u32 %v1651_v39, %v1516_v40  ;;  %v1649_v45 = vld [vmem:[%s2360_s6 + $0x4] sm:$0xf]  ;;  %v1508_v46 = vld [vmem:[%s2360_s6 + $0x8] sm:$0xf0]  ;;  %v1507_v47 = vor.u32 %v1650_v44, %v1506_v43  ;;  %v1643_v51 = vld [vmem:[%s2352_s16 + $0x10] sm:$0xff]  ;;  %p1632_p8 = scmp.ne.s32.totalorder %s2105_s24, 1 }
  0x73   : > { %574 = vmatpush.bf16.msra.mxu0 %v1547_v17  ;;  %v1511_v48 = vor.u32 %v1649_v45, %v1508_v46  ;;  %v1641_v49 = vld [vmem:[%s2352_s16] sm:$0xff]  ;;  %v1642_v50 = vld [vmem:[%s2352_s16 + $0x8] sm:$0xff]  ;;  %v1644_v52 = vld [vmem:[%s2352_s16 + $0x18] sm:$0xff] }
  0x74   : > { %623 = vmatpush.bf16.msra.mxu1 %v1551_v18  ;;  %v1645_v53 = vld [vmem:[%s2352_s16 + $0x20] sm:$0xff]  ;;  %v1646_v54 = vld [vmem:[%s2352_s16 + $0x28] sm:$0xff]  ;;  %v1647_v55 = vld [vmem:[%s2352_s16 + $0x30] sm:$0xff] }
  0x75   : > { %v1672_v56 = vld [vmem:[%s2368_s9 + $0x38] sm:$0xff]  ;;  %v1671_v58 = vld [vmem:[%s2368_s9 + $0x30] sm:$0xff]  ;;  %v1670_v60 = vld [vmem:[%s2368_s9 + $0x28] sm:$0xff] }
  0x76   : > { %v1680_v57 = vld [vmem:[%s2368_s9 + $0x78] sm:$0xff]  ;;  %1118 = vmatpush.bf16.msra.mxu2 %v1672_v56  ;;  %v1679_v59 = vld [vmem:[%s2368_s9 + $0x70] sm:$0xff]  ;;  %v1678_v61 = vld [vmem:[%s2368_s9 + $0x68] sm:$0xff] }
  0x77   : > { %575 = vmatpush.bf16.msra.mxu0 %v1539_v23  ;;  %1167 = vmatpush.bf16.msra.mxu3 %v1680_v57  ;;  %v1669_v62 = vld [vmem:[%s2368_s9 + $0x20] sm:$0xff]  ;;  %v1648_v0 = vld [vmem:[%s2352_s16 + $0x38] sm:$0xff]  ;;  %v438_v5 = vld [vmem:[%s2366_s10] sm:$0x3] }
  0x78   : > { %624 = vmatpush.bf16.msra.mxu1 %v1543_v24  ;;  %v1677_v63 = vld [vmem:[%s2368_s9 + $0x60] sm:$0xff]  ;;  %v1668_v1 = vld [vmem:[%s2368_s9 + $0x18] sm:$0xff]  ;;  %v1667_v3 = vld [vmem:[%s2368_s9 + $0x10] sm:$0xff]  ;;  %v2437_v9 = vperm.slane %v438_v5, 0  ;;  %v2440_v11 = vperm.slane %v438_v5, 1 }
  0x79   : > { %v1676_v2 = vld [vmem:[%s2368_s9 + $0x58] sm:$0xff]  ;;  %v1675_v4 = vld [vmem:[%s2368_s9 + $0x50] sm:$0xff]  ;;  %v1666_v6 = vld [vmem:[%s2368_s9 + $0x8] sm:$0xff] }
  0x7a   : > { %1119 = vmatpush.bf16.msra.mxu2 %v1671_v58  ;;  %v1674_v7 = vld [vmem:[%s2368_s9 + $0x48] sm:$0xff]  ;;  %v1665_v8 = vld [vmem:[%s2368_s9] sm:$0xff] }
  0x7b   : > { %576 = vmatpush.bf16.msra.mxu0 %v1531_v29  ;;  %1168 = vmatpush.bf16.msra.mxu3 %v1679_v59  ;;  %v1673_v10 = vld [vmem:[%s2368_s9 + $0x40] sm:$0xff] }
  0x7c   : > { %625 = vmatpush.bf16.msra.mxu1 %v1535_v30 }
  0x7e   : > { %1120 = vmatpush.bf16.msra.mxu2 %v1670_v60 }
  0x7f   : > { %577 = vmatpush.bf16.msra.mxu0 %v1523_v35  ;;  %1169 = vmatpush.bf16.msra.mxu3 %v1678_v61 }
  0x80   : > { %626 = vmatpush.bf16.msra.mxu1 %v1527_v36 }
  0x82   : > { %1121 = vmatpush.bf16.msra.mxu2 %v1669_v62 }
  0x83   : > { %578 = vmatpush.bf16.msra.mxu0 %v1515_v41  ;;  %1170 = vmatpush.bf16.msra.mxu3 %v1677_v63 }
  0x84   : > { %627 = vmatpush.bf16.msra.mxu1 %v1519_v42 }
  0x86   : > { %1122 = vmatpush.bf16.msra.mxu2 %v1668_v1 }
  0x87   : > { %579 = vmatpush.bf16.msra.mxu0 %v1507_v47  ;;  %1171 = vmatpush.bf16.msra.mxu3 %v1676_v2 }
  0x88   : > { %628 = vmatpush.bf16.msra.mxu1 %v1511_v48 }
  0x8a   : > { %580 = vmatmul.bf16.vlgmr.msra.gmra.mxu0 %v1641_v49  ;;  %1123 = vmatpush.bf16.msra.mxu2 %v1667_v3 }
  0x8b   : > { %629 = vmatmul.bf16.vlgmr.msra.gmra.mxu1 %v1641_v49  ;;  %1172 = vmatpush.bf16.msra.mxu3 %v1675_v4 }
  0x8e   : > { %1124 = vmatpush.bf16.msra.mxu2 %v1666_v6 }
  0x8f   : > { %1173 = vmatpush.bf16.msra.mxu3 %v1674_v7 }
  0x92   : > { %1125 = vmatpush.bf16.msra.mxu2 %v1665_v8 }
  0x93   : > { %1174 = vmatpush.bf16.msra.mxu3 %v1673_v10 }
  0x9a   : > { %585 = vmatmul.bf16.gmra.mxu0 %v1642_v50 }
  0x9b   : > { %634 = vmatmul.bf16.gmra.mxu1 %v1642_v50 }
  0xaa   : > { %590 = vmatmul.bf16.gmra.mxu0 %v1643_v51 }
  0xab   : > { %639 = vmatmul.bf16.gmra.mxu1 %v1643_v51 }
  0xba   : > { %595 = vmatmul.bf16.gmra.mxu0 %v1644_v52 }
  0xbb   : > { %644 = vmatmul.bf16.gmra.mxu1 %v1644_v52 }
  0xca   : > { %600 = vmatmul.bf16.gmra.mxu0 %v1645_v53 }
  0xcb   : > { %649 = vmatmul.bf16.gmra.mxu1 %v1645_v53 }
  0xda   : > { %605 = vmatmul.bf16.gmra.mxu0 %v1646_v54 }
  0xdb   : > { %654 = vmatmul.bf16.gmra.mxu1 %v1646_v54 }
  0xea   : > { %610 = vmatmul.bf16.gmra.mxu0 %v1647_v55 }
  0xeb   : > { %659 = vmatmul.bf16.gmra.mxu1 %v1647_v55 }
  0xfa   : > { %615 = vmatmul.bf16.gmra.mxu0 %v1648_v0 }
  0xfb   : > { %664 = vmatmul.bf16.gmra.mxu1 %v1648_v0 }
 0x107   : > { %v581_v12 = vpop.f32.mrf.mxu0 }
 0x108   : > { %v582_v13 = vadd.f32 %v581_v12, %v2437_v9  ;;  %v630_v14 = vpop.f32.mrf.mxu1 }
 0x109   : > { %v631_v15 = vadd.f32 %v630_v14, %v2440_v11 }
 0x10a   : > { %v702_v16 = vmul.f32 0.044715, %v582_v13  ;;  %v670_v61 = vmul.f32 0.5, %v582_v13 }
 0x10b   : > { %v703_v17 = vmul.f32 0.044715, %v631_v15  ;;  %v671_v3 = vmul.f32 0.5, %v631_v15 }
 0x10c   : > { %v734_v18 = vmul.f32 %v702_v16, %v582_v13 }
 0x10d   : > { %v735_v19 = vmul.f32 %v703_v17, %v631_v15 }
 0x10e   : > { %v766_v20 = vmul.f32 %v734_v18, %v582_v13 }
 0x10f   : > { %v583_v21 = vpop.f32.mrf.mxu0  ;;  %v767_v22 = vmul.f32 %v735_v19, %v631_v15 }
 0x110   : > { %v584_v23 = vadd.f32 %v583_v21, %v2437_v9  ;;  %v632_v24 = vpop.f32.mrf.mxu1  ;;  %v798_v25 = vadd.f32 %v766_v20, %v582_v13 }
 0x111   : > { %v633_v26 = vadd.f32 %v632_v24, %v2440_v11  ;;  %v799_v27 = vadd.f32 %v767_v22, %v631_v15 }
 0x112   : > { %v704_v28 = vmul.f32 0.044715, %v584_v23  ;;  %v830_v31 = vmul.f32 0.7978846, %v798_v25  ;;  %v672_v1 = vmul.f32 0.5, %v584_v23 }
 0x113   : > { %v705_v29 = vmul.f32 0.044715, %v633_v26  ;;  %v831_v33 = vmul.f32 0.7978846, %v799_v27  ;;  %v673_v4 = vmul.f32 0.5, %v633_v26 }
 0x114   : > { %v736_v30 = vmul.f32 %v704_v28, %v584_v23  ;;  %1807 = vtanh.f32 %v830_v31 }
 0x115   : > { %v737_v32 = vmul.f32 %v705_v29, %v633_v26  ;;  %1809 = vtanh.f32 %v831_v33 }
 0x116   : > { %v768_v34 = vmul.f32 %v736_v30, %v584_v23 }
 0x117   : > { %v586_v35 = vpop.f32.mrf.mxu0  ;;  %v769_v36 = vmul.f32 %v737_v32, %v633_v26 }
 0x118   : > { %v2447_v37 = vadd.f32 %v586_v35, %v2437_v9  ;;  %v635_v38 = vpop.f32.mrf.mxu1  ;;  %v800_v39 = vadd.f32 %v768_v34, %v584_v23 }
 0x119   : > { %v2450_v40 = vadd.f32 %v635_v38, %v2440_v11  ;;  %v801_v41 = vadd.f32 %v769_v36, %v633_v26 }
 0x11a   : > { %v706_v42 = vmul.f32 0.044715, %v2447_v37  ;;  %v832_v43 = vmul.f32 0.7978846, %v800_v39  ;;  %v1808_v48 = vpop.eup %1807 }
 0x11b   : > { %v707_v44 = vmul.f32 0.044715, %v2450_v40  ;;  %v833_v45 = vmul.f32 0.7978846, %v801_v41  ;;  %v1810_v50 = vpop.eup %1809  ;;  %v894_v57 = vadd.f32 1.0, %v1808_v48 }
 0x11c   : > { %1811 = vtanh.f32 %v832_v43  ;;  %v738_v46 = vmul.f32 %v706_v42, %v2447_v37  ;;  %v895_v62 = vadd.f32 1.0, %v1810_v50 }
 0x11d   : > { %1813 = vtanh.f32 %v833_v45  ;;  %v739_v47 = vmul.f32 %v707_v44, %v2450_v40  ;;  %v926_v8 = vmul.f32 %v894_v57, %v670_v61 }
 0x11e   : > { %v770_v49 = vmul.f32 %v738_v46, %v2447_v37  ;;  %v927_v16 = vmul.f32 %v895_v62, %v671_v3 }
 0x11f   : > { %v588_v51 = vpop.f32.mrf.mxu0  ;;  %v771_v52 = vmul.f32 %v739_v47, %v2450_v40  ;;  %v674_v47 = vmul.f32 0.5, %v2447_v37 }
 0x120   : > { %v2459_v53 = vadd.f32 %v588_v51, %v2437_v9  ;;  %v637_v54 = vpop.f32.mrf.mxu1  ;;  %v802_v55 = vadd.f32 %v770_v49, %v2447_v37 }
 0x121   : > { %v2463_v56 = vadd.f32 %v637_v54, %v2440_v11  ;;  %v803_v58 = vadd.f32 %v771_v52, %v2450_v40  ;;  %v675_v54 = vmul.f32 0.5, %v2450_v40 }
 0x122   : > { %v1812_v59 = vpop.eup %1811  ;;  %v708_v60 = vmul.f32 0.044715, %v2459_v53  ;;  %v834_v7 = vmul.f32 0.7978846, %v802_v55  ;;  %v676_v51 = vmul.f32 0.5, %v2459_v53 }
 0x123   : > { %v1814_v63 = vpop.eup %1813  ;;  %v709_v0 = vmul.f32 0.044715, %v2463_v56  ;;  %v896_v2 = vadd.f32 1.0, %v1812_v59  ;;  %v835_v14 = vmul.f32 0.7978846, %v803_v58  ;;  %v677_v55 = vmul.f32 0.5, %v2463_v56 }
 0x124   : > { %v897_v5 = vadd.f32 1.0, %v1814_v63  ;;  %v740_v6 = vmul.f32 %v708_v60, %v2459_v53  ;;  %1815 = vtanh.f32 %v834_v7 }
 0x125   : > { %v928_v10 = vmul.f32 %v896_v2, %v672_v1  ;;  %v741_v12 = vmul.f32 %v709_v0, %v2463_v56  ;;  %1817 = vtanh.f32 %v835_v14 }
 0x126   : > { %v929_v17 = vmul.f32 %v897_v5, %v673_v4  ;;  %v772_v13 = vmul.f32 %v740_v6, %v2459_v53 }
 0x127   : > { %v591_v18 = vpop.f32.mrf.mxu0  ;;  %v958_v19 = vpack.c.bf16 %v928_v10, %v926_v8  ;;  %v773_v20 = vmul.f32 %v741_v12, %v2463_v56 }
 0x128   : > { %v2473_v15 = vadd.f32 %v591_v18, %v2437_v9  ;;  %v640_v21 = vpop.f32.mrf.mxu1  ;;  %v959_v22 = vpack.c.bf16 %v929_v17, %v927_v16  ;;  %v804_v23 = vadd.f32 %v772_v13, %v2459_v53 }
 0x129   : > { %v2477_v24 = vadd.f32 %v640_v21, %v2440_v11  ;;  %1126 = vmatmul.bf16.vlgmr.msra.gmra.mxu2 %v958_v19  ;;  %v805_v25 = vadd.f32 %v773_v20, %v2463_v56 }
 0x12a   : > { %v710_v26 = vmul.f32 0.044715, %v2473_v15  ;;  %1175 = vmatmul.bf16.vlgmr.msra.gmra.mxu3 %v959_v22  ;;  %v836_v27 = vmul.f32 0.7978846, %v804_v23  ;;  %v1816_v32 = vpop.eup %1815 }
 0x12b   : > { %v711_v28 = vmul.f32 0.044715, %v2477_v24  ;;  %v837_v29 = vmul.f32 0.7978846, %v805_v25  ;;  %v1818_v34 = vpop.eup %1817  ;;  %v898_v43 = vadd.f32 1.0, %v1816_v32 }
 0x12c   : > { %1819 = vtanh.f32 %v836_v27  ;;  %v742_v30 = vmul.f32 %v710_v26, %v2473_v15  ;;  %v899_v48 = vadd.f32 1.0, %v1818_v34 }
 0x12d   : > { %1821 = vtanh.f32 %v837_v29  ;;  %v743_v31 = vmul.f32 %v711_v28, %v2477_v24  ;;  %v930_v60 = vmul.f32 %v898_v43, %v674_v47 }
 0x12e   : > { %v774_v33 = vmul.f32 %v742_v30, %v2473_v15  ;;  %v931_v63 = vmul.f32 %v899_v48, %v675_v54 }
 0x12f   : > { %v593_v35 = vpop.f32.mrf.mxu0  ;;  %v775_v36 = vmul.f32 %v743_v31, %v2477_v24  ;;  %v678_v31 = vmul.f32 0.5, %v2473_v15 }
 0x130   : > { %v2487_v38 = vadd.f32 %v593_v35, %v2437_v9  ;;  %v642_v39 = vpop.f32.mrf.mxu1  ;;  %v806_v41 = vadd.f32 %v774_v33, %v2473_v15 }
 0x131   : > { %v2491_v42 = vadd.f32 %v642_v39, %v2440_v11  ;;  %v807_v44 = vadd.f32 %v775_v36, %v2477_v24  ;;  %v679_v39 = vmul.f32 0.5, %v2477_v24 }
 0x132   : > { %v1820_v45 = vpop.eup %1819  ;;  %v712_v46 = vmul.f32 0.044715, %v2487_v38  ;;  %v838_v59 = vmul.f32 0.7978846, %v806_v41  ;;  %v680_v35 = vmul.f32 0.5, %v2487_v38 }
 0x133   : > { %v1822_v49 = vpop.eup %1821  ;;  %v713_v50 = vmul.f32 0.044715, %v2491_v42  ;;  %v900_v52 = vadd.f32 1.0, %v1820_v45  ;;  %v839_v37 = vmul.f32 0.7978846, %v807_v44  ;;  %v681_v41 = vmul.f32 0.5, %v2491_v42 }
 0x134   : > { %v901_v57 = vadd.f32 1.0, %v1822_v49  ;;  %v744_v58 = vmul.f32 %v712_v46, %v2487_v38  ;;  %1823 = vtanh.f32 %v838_v59 }
 0x135   : > { %v932_v61 = vmul.f32 %v900_v52, %v676_v51  ;;  %v745_v62 = vmul.f32 %v713_v50, %v2491_v42  ;;  %1825 = vtanh.f32 %v839_v37 }
 0x136   : > { %v933_v0 = vmul.f32 %v901_v57, %v677_v55  ;;  %v776_v1 = vmul.f32 %v744_v58, %v2487_v38 }
 0x137   : > { %v596_v2 = vpop.f32.mrf.mxu0  ;;  %v960_v53 = vpack.c.bf16 %v932_v61, %v930_v60  ;;  %v777_v3 = vmul.f32 %v745_v62, %v2491_v42 }
 0x138   : > { %v2505_v40 = vadd.f32 %v596_v2, %v2437_v9  ;;  %v645_v56 = vpop.f32.mrf.mxu1  ;;  %v961_v4 = vpack.c.bf16 %v933_v0, %v931_v63  ;;  %v808_v5 = vadd.f32 %v776_v1, %v2487_v38 }
 0x139   : > { %v2509_v6 = vadd.f32 %v645_v56, %v2440_v11  ;;  %1131 = vmatmul.bf16.gmra.mxu2 %v960_v53  ;;  %v809_v7 = vadd.f32 %v777_v3, %v2491_v42 }
 0x13a   : > { %v714_v8 = vmul.f32 0.044715, %v2505_v40  ;;  %1180 = vmatmul.bf16.gmra.mxu3 %v961_v4  ;;  %v840_v10 = vmul.f32 0.7978846, %v808_v5  ;;  %v1824_v13 = vpop.eup %1823 }
 0x13b   : > { %v715_v12 = vmul.f32 0.044715, %v2509_v6  ;;  %v841_v14 = vmul.f32 0.7978846, %v809_v7  ;;  %v1826_v19 = vpop.eup %1825  ;;  %v902_v27 = vadd.f32 1.0, %v1824_v13 }
 0x13c   : > { %1827 = vtanh.f32 %v840_v10  ;;  %v746_v16 = vmul.f32 %v714_v8, %v2505_v40  ;;  %v903_v32 = vadd.f32 1.0, %v1826_v19 }
 0x13d   : > { %1829 = vtanh.f32 %v841_v14  ;;  %v747_v17 = vmul.f32 %v715_v12, %v2509_v6  ;;  %v934_v46 = vmul.f32 %v902_v27, %v678_v31 }
 0x13e   : > { %v778_v18 = vmul.f32 %v746_v16, %v2505_v40  ;;  %v935_v49 = vmul.f32 %v903_v32, %v679_v39 }
 0x13f   : > { %v598_v20 = vpop.f32.mrf.mxu0  ;;  %v779_v21 = vmul.f32 %v747_v17, %v2509_v6  ;;  %v682_v17 = vmul.f32 0.5, %v2505_v40 }
 0x140   : > { %v2519_v22 = vadd.f32 %v598_v20, %v2437_v9  ;;  %v647_v23 = vpop.f32.mrf.mxu1  ;;  %v810_v25 = vadd.f32 %v778_v18, %v2505_v40 }
 0x141   : > { %v2523_v26 = vadd.f32 %v647_v23, %v2440_v11  ;;  %v811_v28 = vadd.f32 %v779_v21, %v2509_v6  ;;  %v683_v23 = vmul.f32 0.5, %v2509_v6 }
 0x142   : > { %v1828_v29 = vpop.eup %1827  ;;  %v716_v30 = vmul.f32 0.044715, %v2519_v22  ;;  %v842_v45 = vmul.f32 0.7978846, %v810_v25  ;;  %v684_v20 = vmul.f32 0.5, %v2519_v22 }
 0x143   : > { %v1830_v33 = vpop.eup %1829  ;;  %v717_v34 = vmul.f32 0.044715, %v2523_v26  ;;  %v904_v36 = vadd.f32 1.0, %v1828_v29  ;;  %v843_v15 = vmul.f32 0.7978846, %v811_v28  ;;  %v685_v25 = vmul.f32 0.5, %v2523_v26 }
 0x144   : > { %v905_v43 = vadd.f32 1.0, %v1830_v33  ;;  %v748_v44 = vmul.f32 %v716_v30, %v2519_v22  ;;  %1831 = vtanh.f32 %v842_v45 }
 0x145   : > { %v936_v47 = vmul.f32 %v904_v36, %v680_v35  ;;  %v749_v48 = vmul.f32 %v717_v34, %v2523_v26  ;;  %1833 = vtanh.f32 %v843_v15 }
 0x146   : > { %v937_v50 = vmul.f32 %v905_v43, %v681_v41  ;;  %v780_v51 = vmul.f32 %v748_v44, %v2519_v22 }
 0x147   : > { %v601_v52 = vpop.f32.mrf.mxu0  ;;  %v962_v38 = vpack.c.bf16 %v936_v47, %v934_v46  ;;  %v781_v54 = vmul.f32 %v749_v48, %v2523_v26 }
 0x148   : > { %v2537_v24 = vadd.f32 %v601_v52, %v2437_v9  ;;  %v650_v42 = vpop.f32.mrf.mxu1  ;;  %v963_v55 = vpack.c.bf16 %v937_v50, %v935_v49  ;;  %v812_v57 = vadd.f32 %v780_v51, %v2519_v22 }
 0x149   : > { %v2541_v58 = vadd.f32 %v650_v42, %v2440_v11  ;;  %1136 = vmatmul.bf16.gmra.mxu2 %v962_v38  ;;  %v813_v59 = vadd.f32 %v781_v54, %v2523_v26 }
 0x14a   : > { %v718_v60 = vmul.f32 0.044715, %v2537_v24  ;;  %1185 = vmatmul.bf16.gmra.mxu3 %v963_v55  ;;  %v844_v61 = vmul.f32 0.7978846, %v812_v57  ;;  %v1832_v1 = vpop.eup %1831 }
 0x14b   : > { %v719_v62 = vmul.f32 0.044715, %v2541_v58  ;;  %v845_v37 = vmul.f32 0.7978846, %v813_v59  ;;  %v1834_v53 = vpop.eup %1833  ;;  %v906_v10 = vadd.f32 1.0, %v1832_v1 }
 0x14c   : > { %1835 = vtanh.f32 %v844_v61  ;;  %v750_v63 = vmul.f32 %v718_v60, %v2537_v24  ;;  %v907_v13 = vadd.f32 1.0, %v1834_v53 }
 0x14d   : > { %1837 = vtanh.f32 %v845_v37  ;;  %v751_v0 = vmul.f32 %v719_v62, %v2541_v58  ;;  %v938_v30 = vmul.f32 %v906_v10, %v682_v17 }
 0x14e   : > { %v782_v2 = vmul.f32 %v750_v63, %v2537_v24  ;;  %v939_v33 = vmul.f32 %v907_v13, %v683_v23 }
 0x14f   : > { %v603_v3 = vpop.f32.mrf.mxu0  ;;  %v783_v56 = vmul.f32 %v751_v0, %v2541_v58  ;;  %v686_v0 = vmul.f32 0.5, %v2537_v24 }
 0x150   : > { %v2551_v4 = vadd.f32 %v603_v3, %v2437_v9  ;;  %v652_v5 = vpop.f32.mrf.mxu1  ;;  %v814_v7 = vadd.f32 %v782_v2, %v2537_v24 }
 0x151   : > { %v2555_v8 = vadd.f32 %v652_v5, %v2440_v11  ;;  %v815_v12 = vadd.f32 %v783_v56, %v2541_v58  ;;  %v687_v5 = vmul.f32 0.5, %v2541_v58 }
 0x152   : > { %v1836_v14 = vpop.eup %1835  ;;  %v720_v16 = vmul.f32 0.044715, %v2551_v4  ;;  %v846_v29 = vmul.f32 0.7978846, %v814_v7  ;;  %v688_v3 = vmul.f32 0.5, %v2551_v4 }
 0x153   : > { %v1838_v18 = vpop.eup %1837  ;;  %v721_v19 = vmul.f32 0.044715, %v2555_v8  ;;  %v908_v21 = vadd.f32 1.0, %v1836_v14  ;;  %v847_v40 = vmul.f32 0.7978846, %v815_v12  ;;  %v689_v7 = vmul.f32 0.5, %v2555_v8 }
 0x154   : > { %v909_v27 = vadd.f32 1.0, %v1838_v18  ;;  %v752_v28 = vmul.f32 %v720_v16, %v2551_v4  ;;  %1839 = vtanh.f32 %v846_v29 }
 0x155   : > { %v940_v31 = vmul.f32 %v908_v21, %v684_v20  ;;  %v753_v32 = vmul.f32 %v721_v19, %v2555_v8  ;;  %1841 = vtanh.f32 %v847_v40 }
 0x156   : > { %v941_v34 = vmul.f32 %v909_v27, %v685_v25  ;;  %v784_v35 = vmul.f32 %v752_v28, %v2551_v4 }
 0x157   : > { %v606_v36 = vpop.f32.mrf.mxu0  ;;  %v964_v22 = vpack.c.bf16 %v940_v31, %v938_v30  ;;  %v785_v39 = vmul.f32 %v753_v32, %v2555_v8 }
 0x158   : > { %v2569_v6 = vadd.f32 %v606_v36, %v2437_v9  ;;  %v655_v26 = vpop.f32.mrf.mxu1  ;;  %v965_v41 = vpack.c.bf16 %v941_v34, %v939_v33  ;;  %v816_v43 = vadd.f32 %v784_v35, %v2551_v4 }
 0x159   : > { %v2573_v44 = vadd.f32 %v655_v26, %v2440_v11  ;;  %1141 = vmatmul.bf16.gmra.mxu2 %v964_v22  ;;  %v817_v45 = vadd.f32 %v785_v39, %v2555_v8 }
 0x15a   : > { %v722_v46 = vmul.f32 0.044715, %v2569_v6  ;;  %1190 = vmatmul.bf16.gmra.mxu3 %v965_v41  ;;  %v848_v47 = vmul.f32 0.7978846, %v816_v43  ;;  %v1840_v51 = vpop.eup %1839 }
 0x15b   : > { %v723_v48 = vmul.f32 0.044715, %v2573_v44  ;;  %v849_v15 = vmul.f32 0.7978846, %v817_v45  ;;  %v1842_v38 = vpop.eup %1841  ;;  %v910_v61 = vadd.f32 1.0, %v1840_v51 }
 0x15c   : > { %1843 = vtanh.f32 %v848_v47  ;;  %v754_v49 = vmul.f32 %v722_v46, %v2569_v6  ;;  %v911_v1 = vadd.f32 1.0, %v1842_v38 }
 0x15d   : > { %1845 = vtanh.f32 %v849_v15  ;;  %v755_v50 = vmul.f32 %v723_v48, %v2573_v44  ;;  %v942_v16 = vmul.f32 %v910_v61, %v686_v0 }
 0x15e   : > { %v786_v52 = vmul.f32 %v754_v49, %v2569_v6  ;;  %v943_v18 = vmul.f32 %v911_v1, %v687_v5 }
 0x15f   : > { %v608_v54 = vpop.f32.mrf.mxu0  ;;  %v787_v42 = vmul.f32 %v755_v50, %v2573_v44  ;;  %v690_v50 = vmul.f32 0.5, %v2569_v6 }
 0x160   : > { %v2583_v55 = vadd.f32 %v608_v54, %v2437_v9  ;;  %v657_v57 = vpop.f32.mrf.mxu1  ;;  %v818_v59 = vadd.f32 %v786_v52, %v2569_v6 }
 0x161   : > { %v2587_v60 = vadd.f32 %v657_v57, %v2440_v11  ;;  %v819_v62 = vadd.f32 %v787_v42, %v2573_v44  ;;  %v691_v57 = vmul.f32 0.5, %v2573_v44 }
 0x162   : > { %v1844_v37 = vpop.eup %1843  ;;  %v724_v63 = vmul.f32 0.044715, %v2583_v55  ;;  %v850_v14 = vmul.f32 0.7978846, %v818_v59  ;;  %v692_v54 = vmul.f32 0.5, %v2583_v55 }
 0x163   : > { %v1846_v2 = vpop.eup %1845  ;;  %v725_v53 = vmul.f32 0.044715, %v2587_v60  ;;  %v912_v56 = vadd.f32 1.0, %v1844_v37  ;;  %v851_v24 = vmul.f32 0.7978846, %v819_v62  ;;  %v693_v59 = vmul.f32 0.5, %v2587_v60 }
 0x164   : > { %v913_v10 = vadd.f32 1.0, %v1846_v2  ;;  %v756_v12 = vmul.f32 %v724_v63, %v2583_v55  ;;  %1847 = vtanh.f32 %v850_v14 }
 0x165   : > { %v944_v17 = vmul.f32 %v912_v56, %v688_v3  ;;  %v757_v13 = vmul.f32 %v725_v53, %v2587_v60  ;;  %1849 = vtanh.f32 %v851_v24 }
 0x166   : > { %v945_v19 = vmul.f32 %v913_v10, %v689_v7  ;;  %v788_v20 = vmul.f32 %v756_v12, %v2583_v55 }
 0x167   : > { %v611_v21 = vpop.f32.mrf.mxu0  ;;  %v966_v4 = vpack.c.bf16 %v944_v17, %v942_v16  ;;  %v789_v23 = vmul.f32 %v757_v13, %v2587_v60 }
 0x168   : > { %v2601_v58 = vadd.f32 %v611_v21, %v2437_v9  ;;  %v660_v8 = vpop.f32.mrf.mxu1  ;;  %v967_v25 = vpack.c.bf16 %v945_v19, %v943_v18  ;;  %v820_v27 = vadd.f32 %v788_v20, %v2583_v55 }
 0x169   : > { %v2605_v28 = vadd.f32 %v660_v8, %v2440_v11  ;;  %1146 = vmatmul.bf16.gmra.mxu2 %v966_v4  ;;  %v821_v29 = vadd.f32 %v789_v23, %v2587_v60 }
 0x16a   : > { %v726_v30 = vmul.f32 0.044715, %v2601_v58  ;;  %1195 = vmatmul.bf16.gmra.mxu3 %v967_v25  ;;  %v852_v31 = vmul.f32 0.7978846, %v820_v27  ;;  %v1848_v35 = vpop.eup %1847 }
 0x16b   : > { %v727_v32 = vmul.f32 0.044715, %v2605_v28  ;;  %v853_v40 = vmul.f32 0.7978846, %v821_v29  ;;  %v1850_v22 = vpop.eup %1849  ;;  %v914_v47 = vadd.f32 1.0, %v1848_v35 }
 0x16c   : > { %1851 = vtanh.f32 %v852_v31  ;;  %v758_v33 = vmul.f32 %v726_v30, %v2601_v58  ;;  %v915_v51 = vadd.f32 1.0, %v1850_v22 }
 0x16d   : > { %1853 = vtanh.f32 %v853_v40  ;;  %v759_v34 = vmul.f32 %v727_v32, %v2605_v28  ;;  %v946_v63 = vmul.f32 %v914_v47, %v690_v50 }
 0x16e   : > { %v790_v36 = vmul.f32 %v758_v33, %v2601_v58  ;;  %v947_v2 = vmul.f32 %v915_v51, %v691_v57 }
 0x16f   : > { %v613_v39 = vpop.f32.mrf.mxu0  ;;  %v791_v26 = vmul.f32 %v759_v34, %v2605_v28  ;;  %v694_v34 = vmul.f32 0.5, %v2601_v58 }
 0x170   : > { %v2615_v41 = vadd.f32 %v613_v39, %v2437_v9  ;;  %v662_v43 = vpop.f32.mrf.mxu1  ;;  %v822_v45 = vadd.f32 %v790_v36, %v2601_v58 }
 0x171   : > { %v2619_v46 = vadd.f32 %v662_v43, %v2440_v11  ;;  %v823_v48 = vadd.f32 %v791_v26, %v2605_v28 }
 0x172   : > { %v1852_v15 = vpop.eup %1851  ;;  %v728_v49 = vmul.f32 0.044715, %v2615_v41  ;;  %v854_v37 = vmul.f32 0.7978846, %v822_v45  ;;  %v696_v39 = vmul.f32 0.5, %v2615_v41 }
 0x173   : > { %v1854_v52 = vpop.eup %1853  ;;  %v729_v38 = vmul.f32 0.044715, %v2619_v46  ;;  %v916_v42 = vadd.f32 1.0, %v1852_v15  ;;  %v855_v6 = vmul.f32 0.7978846, %v823_v48  ;;  %v697_v43 = vmul.f32 0.5, %v2619_v46 }
 0x174   : > { %v917_v61 = vadd.f32 1.0, %v1854_v52  ;;  %v760_v62 = vmul.f32 %v728_v49, %v2615_v41  ;;  %1855 = vtanh.f32 %v854_v37 }
 0x175   : > { %v948_v0 = vmul.f32 %v916_v42, %v692_v54  ;;  %v761_v1 = vmul.f32 %v729_v38, %v2619_v46  ;;  %1857 = vtanh.f32 %v855_v6 }
 0x176   : > { %v949_v53 = vmul.f32 %v917_v61, %v693_v59  ;;  %v792_v3 = vmul.f32 %v760_v62, %v2615_v41 }
 0x177   : > { %v616_v56 = vpop.f32.mrf.mxu0  ;;  %v968_v55 = vpack.c.bf16 %v948_v0, %v946_v63  ;;  %v793_v5 = vmul.f32 %v761_v1, %v2619_v46 }
 0x178   : > { %v2633_v44 = vadd.f32 %v616_v56, %v2437_v9  ;;  %v665_v60 = vpop.f32.mrf.mxu1  ;;  %v969_v7 = vpack.c.bf16 %v949_v53, %v947_v2  ;;  %v824_v10 = vadd.f32 %v792_v3, %v2615_v41 }
 0x179   : > { %v2637_v12 = vadd.f32 %v665_v60, %v2440_v11  ;;  %1151 = vmatmul.bf16.gmra.mxu2 %v968_v55  ;;  %v825_v14 = vadd.f32 %v793_v5, %v2619_v46 }
 0x17a   : > { %v730_v16 = vmul.f32 0.044715, %v2633_v44  ;;  %1200 = vmatmul.bf16.gmra.mxu3 %v969_v7  ;;  %v856_v17 = vmul.f32 0.7978846, %v824_v10  ;;  %v1856_v20 = vpop.eup %1855  ;;  %v698_v1 = vmul.f32 0.5, %v2633_v44 }
 0x17b   : > { %v731_v13 = vmul.f32 0.044715, %v2637_v12  ;;  %v857_v24 = vmul.f32 0.7978846, %v825_v14  ;;  %v1858_v4 = vpop.eup %1857  ;;  %v918_v31 = vadd.f32 1.0, %v1856_v20  ;;  %v699_v53 = vmul.f32 0.5, %v2637_v12 }
 0x17c   : > { %1859 = vtanh.f32 %v856_v17  ;;  %v762_v18 = vmul.f32 %v730_v16, %v2633_v44  ;;  %v919_v35 = vadd.f32 1.0, %v1858_v4  ;;  %v974_v17 = vld [vmem:[#allocation2 + $0x30] sm:$0xff] }
 0x17d   : > { %1861 = vtanh.f32 %v857_v24  ;;  %v763_v19 = vmul.f32 %v731_v13, %v2637_v12  ;;  %v950_v48 = vmul.f32 %v918_v31, %v694_v34  ;;  %v978_v34 = vld [vmem:[#allocation2 + $0x50] sm:$0xff] }
 0x17e   : > { %v794_v21 = vmul.f32 %v762_v18, %v2633_v44 }
 0x17f   : > { %v618_v23 = vpop.f32.mrf.mxu0  ;;  %v795_v8 = vmul.f32 %v763_v19, %v2637_v12  ;;  %v975_v19 = vld [vmem:[#allocation2] sm:$0xff] }
 0x180   : > { %v619_v25 = vadd.f32 %v618_v23, %v2437_v9  ;;  %v667_v27 = vpop.f32.mrf.mxu1  ;;  %v826_v29 = vadd.f32 %v794_v21, %v2633_v44  ;;  %v695_v9 = vmul.f32 0.5, %v2605_v28  ;;  %v976_v23 = vld [vmem:[#allocation2 + $0x58] sm:$0xff] }
 0x181   : > { %v668_v30 = vadd.f32 %v667_v27, %v2440_v11  ;;  %v827_v32 = vadd.f32 %v795_v8, %v2637_v12 }
 0x182   : > { %v1860_v40 = vpop.eup %1859  ;;  %v732_v33 = vmul.f32 0.044715, %v619_v25  ;;  %v858_v11 = vmul.f32 0.7978846, %v826_v29  ;;  %v951_v51 = vmul.f32 %v919_v35, %v695_v9  ;;  %v700_v6 = vmul.f32 0.5, %v619_v25 }
 0x183   : > { %v1862_v36 = vpop.eup %1861  ;;  %v733_v22 = vmul.f32 0.044715, %v668_v30  ;;  %v920_v26 = vadd.f32 1.0, %v1860_v40  ;;  %v859_v50 = vmul.f32 0.7978846, %v827_v32  ;;  %v701_v3 = vmul.f32 0.5, %v668_v30 }
 0x184   : > { %v921_v45 = vadd.f32 1.0, %v1862_v36  ;;  %v764_v47 = vmul.f32 %v732_v33, %v619_v25  ;;  %1863 = vtanh.f32 %v858_v11  ;;  %v980_v11 = vld [vmem:[#allocation2 + $0x8] sm:$0xff] }
 0x185   : > { %v952_v15 = vmul.f32 %v920_v26, %v696_v39  ;;  %v765_v49 = vmul.f32 %v733_v22, %v668_v30  ;;  %1865 = vtanh.f32 %v859_v50  ;;  %v979_v26 = vld [vmem:[#allocation2 + $0x68] sm:$0xff] }
 0x186   : > { %v953_v52 = vmul.f32 %v921_v45, %v697_v43  ;;  %v796_v58 = vmul.f32 %v764_v47, %v619_v25 }
 0x187   : > { %v970_v38 = vpack.c.bf16 %v952_v15, %v950_v48  ;;  %v797_v54 = vmul.f32 %v765_v49, %v668_v30 }
 0x188   : > { %v971_v42 = vpack.c.bf16 %v953_v52, %v951_v51  ;;  %v828_v57 = vadd.f32 %v796_v58, %v619_v25  ;;  %v981_v51 = vld [vmem:[#allocation2 + $0x48] sm:$0xff] }
 0x189   : > { %1156 = vmatmul.bf16.gmra.mxu2 %v970_v38  ;;  %v829_v41 = vadd.f32 %v797_v54, %v668_v30  ;;  %v977_v30 = vld [vmem:[#allocation2 + $0x18] sm:$0xff] }
 0x18a   : > { %1205 = vmatmul.bf16.gmra.mxu3 %v971_v42  ;;  %v860_v28 = vmul.f32 0.7978846, %v828_v57  ;;  %v1864_v59 = vpop.eup %1863  ;;  %v982_v42 = vld [vmem:[#allocation2 + $0x40] sm:$0xff] }
 0x18b   : > { %v861_v46 = vmul.f32 0.7978846, %v829_v41  ;;  %v1866_v61 = vpop.eup %1865  ;;  %v922_v62 = vadd.f32 1.0, %v1864_v59  ;;  %v983_v59 = vld [vmem:[#allocation2 + $0x20] sm:$0xff] }
 0x18c   : > { %1867 = vtanh.f32 %v860_v28  ;;  %v923_v63 = vadd.f32 1.0, %v1866_v61 }
 0x18d   : > { %1869 = vtanh.f32 %v861_v46  ;;  %v954_v55 = vmul.f32 %v922_v62, %v698_v1 }
 0x18e   : > { %v955_v60 = vmul.f32 %v923_v63, %v699_v53 }
 0x192   : > { %v1868_v37 = vpop.eup %1867 }
 0x193   : > { %v1870_v0 = vpop.eup %1869  ;;  %v924_v2 = vadd.f32 1.0, %v1868_v37 }
 0x194   : > { %v925_v56 = vadd.f32 1.0, %v1870_v0  ;;  %v984_v0 = vld [vmem:[#allocation2 + $0x10] sm:$0xff] }
 0x195   : > { %v956_v5 = vmul.f32 %v924_v2, %v700_v6 }
 0x196   : > { %v957_v7 = vmul.f32 %v925_v56, %v701_v3  ;;  %v985_v3 = vld [vmem:[#allocation2 + $0x38] sm:$0xff] }
 0x197   : > { %v972_v10 = vpack.c.bf16 %v956_v5, %v954_v55 }
 0x198   : > { %v973_v14 = vpack.c.bf16 %v957_v7, %v955_v60  ;;  %v986_v7 = vld [vmem:[#allocation2 + $0x60] sm:$0xff] }
 0x199   : > { %1161 = vmatmul.bf16.gmra.mxu2 %v972_v10 }
 0x19a   : > { %1210 = vmatmul.bf16.gmra.mxu3 %v973_v14 }
 0x1ac   : > { %v1127_v16 = vpop.f32.mrf.mxu2 }
 0x1ad   : > { %v1176_v13 = vpop.f32.mrf.mxu3 }
 0x1ae   : > { %v1177_v24 = vadd.f32 %v1176_v13, %v1127_v16  ;;  %v987_v13 = vld [vmem:[#allocation2 + $0x70] sm:$0xff] }
 0x1b0   : > { %v1216_v18 = vadd.f32 %v1177_v24, %v974_v17 }
 0x1b2   : > { %1232 = vst [vmem:[#allocation2 + $0x30] sm:$0xff] %v1216_v18 }
 0x1b4   : > { %v1129_v44 = vpop.f32.mrf.mxu2 }
 0x1b5   : > { %v1178_v20 = vpop.f32.mrf.mxu3 }
 0x1b6   : > { %v1179_v12 = vadd.f32 %v1178_v20, %v1129_v44  ;;  %v988_v20 = vld [vmem:[#allocation2 + $0x78] sm:$0xff] }
 0x1b8   : > { %v1217_v21 = vadd.f32 %v1179_v12, %v975_v19 }
 0x1ba   : > { %1233 = vst [vmem:[#allocation2] sm:$0xff] %v1217_v21 }
 0x1bc   : > { %v1132_v4 = vpop.f32.mrf.mxu2 }
 0x1bd   : > { %v1181_v8 = vpop.f32.mrf.mxu3 }
 0x1be   : > { %v1182_v25 = vadd.f32 %v1181_v8, %v1132_v4  ;;  %v989_v8 = vld [vmem:[#allocation2 + $0x28] sm:$0xff] }
 0x1c0   : > { %v1218_v27 = vadd.f32 %v1182_v25, %v976_v23 }
 0x1c2   : > { %1234 = vst [vmem:[#allocation2 + $0x58] sm:$0xff] %v1218_v27 }
 0x1c4   : > { %v1134_v29 = vpop.f32.mrf.mxu2 }
 0x1c5   : > { %v1183_v31 = vpop.f32.mrf.mxu3 }
 0x1c6   : > { %v1184_v32 = vadd.f32 %v1183_v31, %v1134_v29 }
 0x1c8   : > { %v1219_v40 = vadd.f32 %v1184_v32, %v977_v30 }
 0x1ca   : > { %1235 = vst [vmem:[#allocation2 + $0x18] sm:$0xff] %v1219_v40 }
 0x1cc   : > { %v1137_v33 = vpop.f32.mrf.mxu2 }
 0x1cd   : > { %v1186_v35 = vpop.f32.mrf.mxu3 }
 0x1ce   : > { %v1187_v36 = vadd.f32 %v1186_v35, %v1137_v33 }
 0x1d0   : > { %v1220_v22 = vadd.f32 %v1187_v36, %v978_v34 }
 0x1d2   : > { %1236 = vst [vmem:[#allocation2 + $0x50] sm:$0xff] %v1220_v22 }
 0x1d4   : > { %v1139_v39 = vpop.f32.mrf.mxu2 }
 0x1d5   : > { %v1188_v9 = vpop.f32.mrf.mxu3 }
 0x1d6   : > { %v1189_v43 = vadd.f32 %v1188_v9, %v1139_v39 }
 0x1d8   : > { %v1221_v45 = vadd.f32 %v1189_v43, %v979_v26 }
 0x1da   : > { %1237 = vst [vmem:[#allocation2 + $0x68] sm:$0xff] %v1221_v45 }
 0x1dc   : > { %v1142_v47 = vpop.f32.mrf.mxu2 }
 0x1dd   : > { %v1191_v48 = vpop.f32.mrf.mxu3 }
 0x1de   : > { %v1192_v15 = vadd.f32 %v1191_v48, %v1142_v47 }
 0x1e0   : > { %v1222_v49 = vadd.f32 %v1192_v15, %v980_v11 }
 0x1e2   : > { %1238 = vst [vmem:[#allocation2 + $0x8] sm:$0xff] %v1222_v49 }
 0x1e4   : > { %v1144_v50 = vpop.f32.mrf.mxu2 }
 0x1e5   : > { %v1193_v52 = vpop.f32.mrf.mxu3 }
 0x1e6   : > { %v1194_v58 = vadd.f32 %v1193_v52, %v1144_v50 }
 0x1e8   : > { %v1223_v38 = vadd.f32 %v1194_v58, %v981_v51 }
 0x1ea   : > { %1239 = vst [vmem:[#allocation2 + $0x48] sm:$0xff] %v1223_v38 }
 0x1ec   : > { %v1147_v54 = vpop.f32.mrf.mxu2 }
 0x1ed   : > { %v1196_v57 = vpop.f32.mrf.mxu3 }
 0x1ee   : > { %v1197_v41 = vadd.f32 %v1196_v57, %v1147_v54 }
 0x1f0   : > { %v1224_v28 = vadd.f32 %v1197_v41, %v982_v42 }
 0x1f2   : > { %1240 = vst [vmem:[#allocation2 + $0x40] sm:$0xff] %v1224_v28 }
 0x1f4   : > { %v1149_v46 = vpop.f32.mrf.mxu2 }
 0x1f5   : > { %v1198_v61 = vpop.f32.mrf.mxu3 }
 0x1f6   : > { %v1199_v62 = vadd.f32 %v1198_v61, %v1149_v46 }
 0x1f8   : > { %v1225_v37 = vadd.f32 %v1199_v62, %v983_v59 }
 0x1fa   : > { %1241 = vst [vmem:[#allocation2 + $0x20] sm:$0xff] %v1225_v37 }
 0x1fc   : > { %v1152_v63 = vpop.f32.mrf.mxu2 }
 0x1fd   : > { %v1201_v1 = vpop.f32.mrf.mxu3 }
 0x1fe   : > { %v1202_v6 = vadd.f32 %v1201_v1, %v1152_v63 }
 0x200   : > { %v1226_v2 = vadd.f32 %v1202_v6, %v984_v0 }
 0x202   : > { %1242 = vst [vmem:[#allocation2 + $0x10] sm:$0xff] %v1226_v2 }
 0x204   : > { %v1154_v53 = vpop.f32.mrf.mxu2 }
 0x205   : > { %v1203_v56 = vpop.f32.mrf.mxu3 }
 0x206   : > { %v1204_v55 = vadd.f32 %v1203_v56, %v1154_v53 }
 0x208   : > { %v1227_v5 = vadd.f32 %v1204_v55, %v985_v3 }
 0x20a   : > { %1243 = vst [vmem:[#allocation2 + $0x38] sm:$0xff] %v1227_v5 }
 0x20c   : > { %v1157_v60 = vpop.f32.mrf.mxu2 }
 0x20d   : > { %v1206_v10 = vpop.f32.mrf.mxu3 }
 0x20e   : > { %v1207_v14 = vadd.f32 %v1206_v10, %v1157_v60 }
 0x210   : > { %v1228_v16 = vadd.f32 %v1207_v14, %v986_v7 }
 0x212   : > { %1244 = vst [vmem:[#allocation2 + $0x60] sm:$0xff] %v1228_v16 }
 0x214   : > { %v1159_v17 = vpop.f32.mrf.mxu2 }
 0x215   : > { %v1208_v24 = vpop.f32.mrf.mxu3 }
 0x216   : > { %v1209_v18 = vadd.f32 %v1208_v24, %v1159_v17 }
 0x218   : > { %v1229_v44 = vadd.f32 %v1209_v18, %v987_v13 }
 0x21a   : > { %1245 = vst [vmem:[#allocation2 + $0x70] sm:$0xff] %v1229_v44 }
 0x21c   : > { %v1162_v19 = vpop.f32.mrf.mxu2 }
 0x21d   : > { %v1211_v12 = vpop.f32.mrf.mxu3 }
 0x21e   : > { %v1212_v21 = vadd.f32 %v1211_v12, %v1162_v19 }
 0x220   : > { %v1230_v4 = vadd.f32 %v1212_v21, %v988_v20 }
 0x222   : > { %1246 = vst [vmem:[#allocation2 + $0x78] sm:$0xff] %v1230_v4 }
 0x224   : > { %v1164_v23 = vpop.f32.mrf.mxu2 }
 0x225   : > { %v1213_v25 = vpop.f32.mrf.mxu3 }
 0x226   : > { %v1214_v27 = vadd.f32 %v1213_v25, %v1164_v23  ;;  %1251 = sbr.rel (%p1632_p8) target bundleno = 572 (0x23c), region = 64 }
 0x228   : > { %v1231_v29 = vadd.f32 %v1214_v27, %v989_v8 }
 0x22a   : > { %1247 = vst [vmem:[#allocation2 + $0x28] sm:$0xff] %v1231_v29 }
 0x22b   : > { %v1252_v30 = vld [vmem:[#allocation2 + $0x30] sm:$0xff]  ;;  %v1253_v31 = vld [vmem:[#allocation2] sm:$0xff]  ;;  %v1254_v32 = vld [vmem:[#allocation2 + $0x58] sm:$0xff] }
 0x22c   : > { %1268 = vst [vmem:[%s2375_s29] sm:$0xff] %v1252_v30  ;;  %v1255_v40 = vld [vmem:[#allocation2 + $0x18] sm:$0xff]  ;;  %v1256_v33 = vld [vmem:[#allocation2 + $0x50] sm:$0xff]  ;;  %v1257_v34 = vld [vmem:[#allocation2 + $0x68] sm:$0xff] }
 0x22d   : > { %1269 = vst [vmem:[%s2375_s29 + $0x8] sm:$0xff] %v1253_v31  ;;  %v1258_v35 = vld [vmem:[#allocation2 + $0x8] sm:$0xff]  ;;  %v1260_v22 = vld [vmem:[#allocation2 + $0x40] sm:$0xff]  ;;  %v1262_v26 = vld [vmem:[#allocation2 + $0x10] sm:$0xff] }
 0x22e   : > { %1270 = vst [vmem:[%s2375_s29 + $0x10] sm:$0xff] %v1254_v32  ;;  %v1259_v36 = vld [vmem:[#allocation2 + $0x48] sm:$0xff]  ;;  %v1261_v39 = vld [vmem:[#allocation2 + $0x20] sm:$0xff]  ;;  %v1263_v9 = vld [vmem:[#allocation2 + $0x38] sm:$0xff] }
 0x22f   : > { %1271 = vst [vmem:[%s2375_s29 + $0x18] sm:$0xff] %v1255_v40  ;;  %v1264_v43 = vld [vmem:[#allocation2 + $0x60] sm:$0xff]  ;;  %v1265_v45 = vld [vmem:[#allocation2 + $0x70] sm:$0xff]  ;;  %v1266_v47 = vld [vmem:[#allocation2 + $0x78] sm:$0xff] }
 0x230   : > { %1272 = vst [vmem:[%s2375_s29 + $0x20] sm:$0xff] %v1256_v33 }
 0x231   : > { %1273 = vst [vmem:[%s2375_s29 + $0x28] sm:$0xff] %v1257_v34  ;;  %v1267_v11 = vld [vmem:[#allocation2 + $0x28] sm:$0xff] }
 0x232   : > { %1274 = vst [vmem:[%s2375_s29 + $0x30] sm:$0xff] %v1258_v35 }
 0x233   : > { %1275 = vst [vmem:[%s2375_s29 + $0x38] sm:$0xff] %v1259_v36 }
 0x234   : > { %1276 = vst [vmem:[%s2375_s29 + $0x40] sm:$0xff] %v1260_v22 }
 0x235   : > { %1277 = vst [vmem:[%s2375_s29 + $0x48] sm:$0xff] %v1261_v39 }
 0x236   : > { %1278 = vst [vmem:[%s2375_s29 + $0x50] sm:$0xff] %v1262_v26 }
 0x237   : > { %1279 = vst [vmem:[%s2375_s29 + $0x58] sm:$0xff] %v1263_v9 }
 0x238   : > { %1280 = vst [vmem:[%s2375_s29 + $0x60] sm:$0xff] %v1264_v43 }
 0x239   : > { %1281 = vst [vmem:[%s2375_s29 + $0x68] sm:$0xff] %v1265_v45 }
 0x23a   : > { %1282 = vst [vmem:[%s2375_s29 + $0x70] sm:$0xff] %v1266_v47 }
 0x23b   : > { %1283 = vst [vmem:[%s2375_s29 + $0x78] sm:$0xff] %v1267_v11 }
 0x23c PF: > { %s2774_s5 = sld [smem:[#allocation19_spill]]  ;;  %s1297_s23 = sshll.u32 %s2375_s29, 4  ;;  %s1298_s23 = int_to_ptr.vmem [resolvable:$true] %s1297_s23 }
 0x23d   : > { %s2776_s18 = sld [smem:[#allocation31_spill]]  ;;  %s1285_s16 = scalar_lea.sflag [#allocation5], %s2348_s0 }
 0x242   : > { %s1681_s14 = sshll.u32 %s2774_s5, 7 }
 0x243   : > { %s2777_s12 = smov %s2776_s18  ;;  %s1296_s7 = scalar_lea.hbm %s2776_s18, %s1681_s14 }
 0x244   : > { %s1299_s28 = sshll.u32 %s1296_s7, 4  ;;  %s2011_s6 = scalar_lea.hbm %s2777_s12, 256  ;;  %s1300_s28 = int_to_ptr.hbm [resolvable:$true] %s1299_s28 }
 0x245   : > { %s2005_s4 = sshra.s32 %s1300_s28, 4  ;;  %s2006_s4 = int_to_ptr.hbm [resolvable:$true] %s2005_s4 }
 0x246   : > { %s2007_s21 = scalar_lea.hbm %s2006_s4, 128  ;;  %p2012_p4 = scmp.lt.s32.totalorder %s2006_s4, %s2777_s12 }
 0x247   : > { %p2008_p11 = scmp.ne.s32.totalorder %s2006_s4, %s2007_s21  ;;  %p2013_p6 = scmp.lt.s32.totalorder %s2011_s6, %s2007_s21 }
 0x249   : > { %p2009_p12 = pnand %p2008_p11, %p2309_p1  ;;  %p2014_p0 = por %p2013_p6, %p2012_p4 }
 0x24b   : > { %p2010_p13 = pneg %p2009_p12 }
 0x24d   : > { %p2015_p7 = pnand %p2014_p0, %p2010_p13 }
 0x24f   : > { %2018 = shalt.err (!%p2015_p7)
}
 0x250   : > { %s2128_s0 = smov 128   ;;  %s2129_s8 = smov 8  }
 0x251   : > { %1690 = dma.vmem_to_hbm [thread:$0]  (%p2309_p1), %s1298_s23, 2048, %s1300_s28, %s1285_s16, %s2128_s0, %s2128_s0, %s2129_s8  }
 0x252 PF: > { %s2778_s9 = sld [smem:[#allocation21_spill]] }
 0x253   : > { %s2779_s30 = sld [smem:[#allocation17_spill]] }
 0x258   : > { %p1710_p9 = scmp.ge.s32.totalorder %s2778_s9, 2 }
 0x259   : > { %s1314_s20 = sand.u32 1, %s2779_s30  }
 0x25a   : > { %p1706_p10 = pnand %p1710_p9, %p2316_p2  ;;  %s1315_s1 = scalar_lea.sflag [#allocation5], %s1314_s20 }
 0x25c   : > { %p1707_p3 = pneg %p1706_p10 }
 0x25e   : > { %2076 = dma.done.wait (%p1707_p3), %s1315_s1, 2048  }
 0x25f   : > { %2078 = vsyncadd (%p1707_p3), %s1315_s1, 4294965248  ;;  %s27_s28 = sadd.s32 1, %s2778_s9   ;;  %s2781_s11 = sld [smem:[#allocation16_spill]] }
 0x260   : > { %p24_p5 = scmp.ge.s32.totalorder %s27_s28, 6   ;;  %s2782_s20 = sld [smem:[#allocation24_spill]] }
 0x261   : > { %s2783_s5 = sld [smem:[#allocation18_spill]]  ;;  %s2788_s18 = smov %s2085_s19 }
 0x262   : > { %s2784_s23 = sld [smem:[#allocation25_spill]]  ;;  %s2790_s21 = smov %s2097_s22 }
 0x263   : > { %s2785_s25 = sld [smem:[#allocation20_spill]]  ;;  %s2792_s24 = smov %s2113_s26 }
 0x264   : > { %s2786_s14 = sld [smem:[#allocation22_spill]] }
 0x265   : > { %s2787_s27 = sld [smem:[#allocation23_spill]]  ;;  %s2789_s19 = smov %s2781_s11 }
 0x266   :  { %26 = sbr.rel (!%p24_p5) target bundleno = 18 (0x12), region = 130 }
 0x267   : > { %s2791_s22 = smov %s2783_s5 }
 0x26a   : > { %s2793_s26 = smov %s2786_s14 }
 0x26b   :  { %1321 = vsyncpa [#allocation4], 1 }
 0x26c   :  { %1323 = vsyncpa [#allocation4 + $0x1], 1 }
 0x26d   :  { %1324 = vsyncpa [#allocation7], 1 }
 0x26e   :  { %1326 = vsyncpa [#allocation7 + $0x1], 1 }
 0x26f   :  { %1327 = vsyncpa [#allocation10], 1 }
 0x270   :  { %1329 = vsyncpa [#allocation10 + $0x1], 1 }
 0x271   :  { %1330 = vsyncpa [#allocation5], 1 }
 0x272   :  { %1332 = vsyncpa [#allocation5 + $0x1], 1 }

</bundles_post_ra>
